<compile_context>
chip_gen: v7x
topology: tpu7x:2x2x1
jax: 0.10.0
libtpu: 0.0.40
codegen_flags: <defaults>
</compile_context>

<pallas_src>
import functools

import jax
import jax.numpy as jnp
from jax.experimental import pallas as pl
from jax.experimental.pallas import tpu as pltpu

IN_FEATURES = 6
OUT_FEATURES = 8
BN_EPS = 1e-5


def _gcn_fused_kernel(a_ref, x_ref, wt_ref, gb_ref, o_ref, h_scratch,
                      *, batch, nodes):
    """Fused: degree-normalized A @ X -> Linear -> BatchNorm1d(train) -> ReLU."""
    # --- graph propagation: one (N,N)@(N,F_in) matmul per batch element ----
    for b in range(batch):                             # static unroll, B is tiny
        a_b = a_ref[b]                                 # (N, N)
        x_b = x_ref[b * nodes:(b + 1) * nodes, :]      # (N, F_in), static slice
        deg = jnp.sum(a_b, axis=-1, keepdims=True)     # adjacency.sum(-1, keepdim=True)
        # dinv * A * dinv with dinv of shape (N,1) broadcasts both factors over
        # columns -> row normalization, so A_norm @ X == (A @ X) * (1/deg).
        # (deg == 0 -> inf/nan, exactly like degree.pow(-0.5) in PyTorch.)
        inv_deg = pl.reciprocal(deg)                   # exact; EUP slot, off VALU path
        h_b = jnp.dot(a_b, x_b, preferred_element_type=jnp.float32) * inv_deg
        # Sublane-aligned static-slice store into VMEM scratch (no concatenate).
        h_scratch[b * nodes:(b + 1) * nodes, :] = h_b

    h = h_scratch[...]                                 # (B*N, F_in)

    # --- nn.Linear (weight pre-transposed; bias omitted: cancelled by BN) ---
    y = jnp.dot(h, wt_ref[...], preferred_element_type=jnp.float32)  # (B*N, F_out)

    # --- nn.BatchNorm1d (training mode: biased batch stats) + ReLU ---------
    gb = gb_ref[...]                                   # (2, F_out): [gamma; beta]
    gamma = gb[0:1, :]
    beta = gb[1:2, :]
    mean = jnp.mean(y, axis=0, keepdims=True)
    var = jnp.mean((y - mean) ** 2, axis=0, keepdims=True)
    y_hat = (y - mean) * jax.lax.rsqrt(var + BN_EPS)
    o_ref[...] = jnp.maximum(y_hat * gamma + beta, 0.0)


def gcn_layer(x, adjacency, weight, bias, gamma, beta):
    B, N, Fin = x.shape
    Fout = weight.shape[0]

    # Free host/XLA-side plumbing: flatten x, pre-transpose W, pack BN params.
    x_flat = x.reshape(B * N, Fin).astype(jnp.float32)
    adjacency = adjacency.astype(jnp.float32)
    wt = weight.T.astype(jnp.float32)                  # (F_in, F_out)
    # The Linear bias is mathematically a no-op under the following BatchNorm
    # (mean-centering cancels it), so it is intentionally NOT passed in.
    del bias
    gb = jnp.stack([gamma, beta], axis=0).astype(jnp.float32)  # (2, F_out)

    kernel = functools.partial(_gcn_fused_kernel, batch=B, nodes=N)

    out_flat = pl.pallas_call(
        kernel,
        out_shape=jax.ShapeDtypeStruct((B * N, Fout), jnp.float32),
        grid=(1,),
        in_specs=[
            pl.BlockSpec((B, N, N), lambda i: (0, 0, 0)),      # adjacency
            pl.BlockSpec((B * N, Fin), lambda i: (0, 0)),      # x (flattened)
            pl.BlockSpec((Fin, Fout), lambda i: (0, 0)),       # W^T
            pl.BlockSpec((2, Fout), lambda i: (0, 0)),         # [gamma; beta]
        ],
        out_specs=pl.BlockSpec((B * N, Fout), lambda i: (0, 0)),
        scratch_shapes=[pltpu.VMEM((B * N, Fin), jnp.float32)],
        compiler_params=pltpu.CompilerParams(
            dimension_semantics=("arbitrary",)),
    )(adjacency, x_flat, wt, gb)

    return out_flat.reshape(B, N, Fout)


def _reference(x, adjacency, weight, bias, gamma, beta):
    deg = adjacency.sum(axis=-1, keepdims=True)
    dinv = deg ** -0.5
    a_norm = dinv * adjacency * dinv
    h = jnp.matmul(a_norm, x)
    y = jnp.matmul(h, weight.T) + bias
    yf = y.reshape(-1, y.shape[-1])
    mean = yf.mean(axis=0, keepdims=True)
    var = ((yf - mean) ** 2).mean(axis=0, keepdims=True)
    yf = (yf - mean) / jnp.sqrt(var + BN_EPS) * gamma + beta
    return jnp.maximum(yf.reshape(y.shape), 0.0)


if __name__ == "__main__":
    B, N = 2, 16
    key = jax.random.PRNGKey(0)
    kx, ka, kw, kb = jax.random.split(key, 4)

    # Input node features.
    x = jax.random.normal(kx, (B, N, IN_FEATURES), dtype=jnp.float32)

    # Symmetric binary adjacency with self-loops (positive degrees).
    a = (jax.random.uniform(ka, (B, N, N)) > 0.5).astype(jnp.float32)
    a = jnp.maximum(a, jnp.transpose(a, (0, 2, 1)))
    adjacency = jnp.minimum(a + jnp.eye(N, dtype=jnp.float32)[None], 1.0)

    # nn.Linear(6, 8) parameters (deterministic torch-style uniform init).
    bound = 1.0 / (IN_FEATURES ** 0.5)
    weight = jax.random.uniform(kw, (OUT_FEATURES, IN_FEATURES),
                                minval=-bound, maxval=bound, dtype=jnp.float32)
    bias = jax.random.uniform(kb, (OUT_FEATURES,),
                              minval=-bound, maxval=bound, dtype=jnp.float32)

    # nn.BatchNorm1d(8) affine parameters (torch defaults: ones / zeros).
    gamma = jnp.ones((OUT_FEATURES,), dtype=jnp.float32)
    beta = jnp.zeros((OUT_FEATURES,), dtype=jnp.float32)

    out = gcn_layer(x, adjacency, weight, bias, gamma, beta)
    jax.block_until_ready(out)

    # Reference keeps the Linear bias; BatchNorm's mean subtraction cancels it,
    # so the kernel (which omits the bias) must match within fp rounding.
    ref = _reference(x, adjacency, weight, bias, gamma, beta)
    assert jnp.allclose(out, ref, rtol=1e-4, atol=1e-4), "mismatch vs reference"

    print("KERNEL_OK")
</pallas_src>

<mosaic_0001>
module attributes {stable_mosaic.version = 11 : i64} {
  func.func @_gcn_fused_kernel(%arg0: i32, %arg1: memref<2x16x16xf32, #tpu.memory_space<vmem>>, %arg2: memref<32x6xf32, #tpu.memory_space<vmem>>, %arg3: memref<6x8xf32, #tpu.memory_space<vmem>>, %arg4: memref<2x8xf32, #tpu.memory_space<vmem>>, %arg5: memref<32x8xf32, #tpu.memory_space<vmem>>, %arg6: memref<32x6xf32, #tpu.memory_space<vmem>>) attributes {dimension_semantics = [#tpu.dimension_semantics<arbitrary>], iteration_bounds = array<i64: 1>, scalar_prefetch = 0 : i64, scratch_operands = 1 : i64, tpu.core_type = #tpu.core_type<tc>, window_params = [{pipeline_mode = #tpu.pipeline_mode<synchronous>, transform_indices = @transform_0, window_bounds = array<i64: 2, 16, 16>}, {pipeline_mode = #tpu.pipeline_mode<synchronous>, transform_indices = @transform_1, window_bounds = array<i64: 32, 6>}, {pipeline_mode = #tpu.pipeline_mode<synchronous>, transform_indices = @transform_2, window_bounds = array<i64: 6, 8>}, {pipeline_mode = #tpu.pipeline_mode<synchronous>, transform_indices = @transform_3, window_bounds = array<i64: 2, 8>}, {pipeline_mode = #tpu.pipeline_mode<synchronous>, transform_indices = @transform_4, window_bounds = array<i64: 32, 8>}]} {
    %c0 = arith.constant 0 : index
    %c0_0 = arith.constant 0 : index
    %c0_1 = arith.constant 0 : index
    %0 = vector.load %arg1[%c0, %c0_0, %c0_1] : memref<2x16x16xf32, #tpu.memory_space<vmem>>, vector<1x16x16xf32>
    %1 = vector.shape_cast %0 : vector<1x16x16xf32> to vector<16x16xf32>
    %c0_2 = arith.constant 0 : index
    %c0_3 = arith.constant 0 : index
    %2 = vector.load %arg2[%c0_2, %c0_3] : memref<32x6xf32, #tpu.memory_space<vmem>>, vector<16x6xf32>
    %cst = arith.constant dense<0.000000e+00> : vector<16xf32>
    %3 = vector.multi_reduction <add>, %1, %cst [1] : vector<16x16xf32> to vector<16xf32>
    %4 = vector.shape_cast %3 : vector<16xf32> to vector<16x1xf32>
    %5 = tpu.reciprocal %4 : vector<16x1xf32> -> vector<16x1xf32>
    %cst_4 = arith.constant dense<0.000000e+00> : vector<16x6xf32>
    %6 = tpu.matmul %1, %2, %cst_4 {dimension_numbers = #tpu.dot_dimension_numbers<[1], [0], [0], [1], [0, 0, 1, 1], [], []>} : vector<16x16xf32>, vector<16x6xf32>, vector<16x6xf32> -> vector<16x6xf32>
    %7 = vector.broadcast %5 : vector<16x1xf32> to vector<16x6xf32>
    %8 = arith.mulf %6, %7 : vector<16x6xf32>
    %c0_5 = arith.constant 0 : index
    %c0_6 = arith.constant 0 : index
    %9 = vector.load %arg6[%c0_5, %c0_6] : memref<32x6xf32, #tpu.memory_space<vmem>>, vector<16x6xf32>
    tpu.vector_store %arg6[%c0_5, %c0_6], %8 {strides = array<i32>} : memref<32x6xf32, #tpu.memory_space<vmem>>, vector<16x6xf32>,
    %c1 = arith.constant 1 : index
    %c0_7 = arith.constant 0 : index
    %c0_8 = arith.constant 0 : index
    %10 = vector.load %arg1[%c1, %c0_7, %c0_8] : memref<2x16x16xf32, #tpu.memory_space<vmem>>, vector<1x16x16xf32>
    %11 = vector.shape_cast %10 : vector<1x16x16xf32> to vector<16x16xf32>
    %c16 = arith.constant 16 : index
    %c0_9 = arith.constant 0 : index
    %12 = vector.load %arg2[%c16, %c0_9] : memref<32x6xf32, #tpu.memory_space<vmem>>, vector<16x6xf32>
    %cst_10 = arith.constant dense<0.000000e+00> : vector<16xf32>
    %13 = vector.multi_reduction <add>, %11, %cst_10 [1] : vector<16x16xf32> to vector<16xf32>
    %14 = vector.shape_cast %13 : vector<16xf32> to vector<16x1xf32>
    %15 = tpu.reciprocal %14 : vector<16x1xf32> -> vector<16x1xf32>
    %cst_11 = arith.constant dense<0.000000e+00> : vector<16x6xf32>
    %16 = tpu.matmul %11, %12, %cst_11 {dimension_numbers = #tpu.dot_dimension_numbers<[1], [0], [0], [1], [0, 0, 1, 1], [], []>} : vector<16x16xf32>, vector<16x6xf32>, vector<16x6xf32> -> vector<16x6xf32>
    %17 = vector.broadcast %15 : vector<16x1xf32> to vector<16x6xf32>
    %18 = arith.mulf %16, %17 : vector<16x6xf32>
    %c16_12 = arith.constant 16 : index
    %c0_13 = arith.constant 0 : index
    %19 = vector.load %arg6[%c16_12, %c0_13] : memref<32x6xf32, #tpu.memory_space<vmem>>, vector<16x6xf32>
    tpu.vector_store %arg6[%c16_12, %c0_13], %18 {strides = array<i32>} : memref<32x6xf32, #tpu.memory_space<vmem>>, vector<16x6xf32>,
    %c0_14 = arith.constant 0 : index
    %c0_15 = arith.constant 0 : index
    %20 = vector.load %arg6[%c0_14, %c0_15] : memref<32x6xf32, #tpu.memory_space<vmem>>, vector<32x6xf32>
    %c0_16 = arith.constant 0 : index
    %c0_17 = arith.constant 0 : index
    %21 = vector.load %arg3[%c0_16, %c0_17] : memref<6x8xf32, #tpu.memory_space<vmem>>, vector<6x8xf32>
    %cst_18 = arith.constant dense<0.000000e+00> : vector<32x8xf32>
    %22 = tpu.matmul %20, %21, %cst_18 {dimension_numbers = #tpu.dot_dimension_numbers<[1], [0], [0], [1], [0, 0, 1, 1], [], []>} : vector<32x6xf32>, vector<6x8xf32>, vector<32x8xf32> -> vector<32x8xf32>
    %c0_19 = arith.constant 0 : index
    %c0_20 = arith.constant 0 : index
    %23 = vector.load %arg4[%c0_19, %c0_20] : memref<2x8xf32, #tpu.memory_space<vmem>>, vector<2x8xf32>
    %24 = vector.extract_strided_slice %23 {offsets = [0, 0], sizes = [1, 8], strides = [1, 1]} : vector<2x8xf32> to vector<1x8xf32>
    %25 = vector.extract_strided_slice %23 {offsets = [1, 0], sizes = [1, 8], strides = [1, 1]} : vector<2x8xf32> to vector<1x8xf32>
    %cst_21 = arith.constant dense<0.000000e+00> : vector<8xf32>
    %26 = vector.multi_reduction <add>, %22, %cst_21 [0] : vector<32x8xf32> to vector<8xf32>
    %27 = vector.shape_cast %26 : vector<8xf32> to vector<1x8xf32>
    %cst_22 = arith.constant 3.200000e+01 : f32
    %28 = vector.broadcast %cst_22 : f32 to vector<1x8xf32>
    %29 = arith.divf %27, %28 : vector<1x8xf32>
    %30 = vector.broadcast %29 : vector<1x8xf32> to vector<32x8xf32>
    %31 = arith.subf %22, %30 : vector<32x8xf32>
    %32 = arith.mulf %31, %31 : vector<32x8xf32>
    %cst_23 = arith.constant dense<0.000000e+00> : vector<8xf32>
    %33 = vector.multi_reduction <add>, %32, %cst_23 [0] : vector<32x8xf32> to vector<8xf32>
    %34 = vector.shape_cast %33 : vector<8xf32> to vector<1x8xf32>
    %cst_24 = arith.constant 3.200000e+01 : f32
    %35 = vector.broadcast %cst_24 : f32 to vector<1x8xf32>
    %36 = arith.divf %34, %35 : vector<1x8xf32>
    %37 = vector.broadcast %29 : vector<1x8xf32> to vector<32x8xf32>
    %38 = arith.subf %22, %37 : vector<32x8xf32>
    %cst_25 = arith.constant 9.99999974E-6 : f32
    %39 = vector.broadcast %cst_25 : f32 to vector<1x8xf32>
    %40 = arith.addf %36, %39 : vector<1x8xf32>
    %41 = math.rsqrt %40 : vector<1x8xf32>
    %42 = vector.broadcast %41 : vector<1x8xf32> to vector<32x8xf32>
    %43 = arith.mulf %38, %42 : vector<32x8xf32>
    %44 = vector.broadcast %24 : vector<1x8xf32> to vector<32x8xf32>
    %45 = arith.mulf %43, %44 : vector<32x8xf32>
    %46 = vector.broadcast %25 : vector<1x8xf32> to vector<32x8xf32>
    %47 = arith.addf %45, %46 : vector<32x8xf32>
    %cst_26 = arith.constant 0.000000e+00 : f32
    %48 = vector.broadcast %cst_26 : f32 to vector<32x8xf32>
    %49 = arith.maximumf %47, %48 : vector<32x8xf32>
    %c0_27 = arith.constant 0 : index
    %c0_28 = arith.constant 0 : index
    %50 = vector.load %arg5[%c0_27, %c0_28] : memref<32x8xf32, #tpu.memory_space<vmem>>, vector<32x8xf32>
    tpu.vector_store %arg5[%c0_27, %c0_28], %49 {strides = array<i32>} : memref<32x8xf32, #tpu.memory_space<vmem>>, vector<32x8xf32>,
    return
  }
  func.func @transform_0(%arg0: i32) -> (i32, i32, i32) {
    %c0_i32 = arith.constant 0 : i32
    %c0_i32_0 = arith.constant 0 : i32
    %c0_i32_1 = arith.constant 0 : i32
    %c0_i32_2 = arith.constant 0 : i32
    return %c0_i32, %c0_i32_0, %c0_i32_1 : i32, i32, i32
  }
  func.func @transform_1(%arg0: i32) -> (i32, i32) {
    %c0_i32 = arith.constant 0 : i32
    %c0_i32_0 = arith.constant 0 : i32
    %c0_i32_1 = arith.constant 0 : i32
    return %c0_i32, %c0_i32_0 : i32, i32
  }
  func.func @transform_2(%arg0: i32) -> (i32, i32) {
    %c0_i32 = arith.constant 0 : i32
    %c0_i32_0 = arith.constant 0 : i32
    %c0_i32_1 = arith.constant 0 : i32
    return %c0_i32, %c0_i32_0 : i32, i32
  }
  func.func @transform_3(%arg0: i32) -> (i32, i32) {
    %c0_i32 = arith.constant 0 : i32
    %c0_i32_0 = arith.constant 0 : i32
    %c0_i32_1 = arith.constant 0 : i32
    return %c0_i32, %c0_i32_0 : i32, i32
  }
  func.func @transform_4(%arg0: i32) -> (i32, i32) {
    %c0_i32 = arith.constant 0 : i32
    %c0_i32_0 = arith.constant 0 : i32
    %c0_i32_1 = arith.constant 0 : i32
    return %c0_i32, %c0_i32_0 : i32, i32
  }
}

</mosaic_0001>

<bundles_post_ra>
// kernel: tpu_custom_call.1
= control target key start
LH: loop header
LB: loop body
LE: loop exit
PB: predicated region body
PF: predicated region fallthrough
CT: control target
= control target key end

     0   :  { %vm21_vm0 = vcmask 130048   ;;  %vm231_vm1 = vcmask 1045504   ;;  %vm113_vm2 = vcmask 48128   ;;  %vm321_vm3 = vcmask 64512   ;;  %s552_s1 = inlined_call_operand.vmem [shape: f32[32,6], index: 1, kind: input, shape index: {}]   ;;  %s553_s0 = inlined_call_operand.vmem [shape: f32[2,16,16], index: 0, kind: input, shape index: {}]   ;;  %s554_s2 = inlined_call_operand.vmem [shape: f32[6,8], index: 2, kind: input, shape index: {}]   ;;  %s555_s3 = inlined_call_operand.vmem [shape: f32[2,8], index: 3, kind: input, shape index: {}]   ;;  %s556_s4 = inlined_call_operand.vmem [shape: f32[32,8], index: 4, kind: output, shape index: {}]  }
   0x1   :  { %v19_v0 = vld [vmem:[%s552_s1] sm:$0xff]  ;;  %v20_v1 = vld [vmem:[%s552_s1 + $0x8] sm:$0xff]  ;;  %v119_v4 = vld [vmem:[%s552_s1 + $0x10] sm:$0xff] }
   0x2   :  { %v17_v2 = vld [vmem:[%s553_s0] sm:$0xff]  ;;  %v439_v3 = vpack.c.bf16 %v20_v1, %v19_v0  ;;  %v120_v5 = vld [vmem:[%s552_s1 + $0x18] sm:$0xff]  ;;  %v18_v7 = vld [vmem:[%s553_s0 + $0x8] sm:$0xff] }
   0x3   :  { %421 = vmatprep.mubr.msk.f32.mxu1 %vm21_vm0, %v17_v2  ;;  %v22_v6 = vsel %vm21_vm0, %v17_v2, 0.0  ;;  %v443_v8 = vpack.c.bf16 %v120_v5, %v119_v4  ;;  %v395_v9 = vld [vmem:[%s553_s0 + $0x10] sm:$0xff]  ;;  %v25_v11 = vsel %vm21_vm0, %v18_v7, 0.0  ;;  %v396_v12 = vld [vmem:[%s553_s0 + $0x18] sm:$0xff]  ;;  %v218_v14 = vld [vmem:[%s554_s2] sm:$0x3f] }
   0x4   :  { %23 = vadd.xlane.f32.xlu0 %v22_v6  ;;  %440 = vmatprep.subr.bf16.mxu1 %v439_v3  ;;  %v121_v10 = vsel %vm21_vm0, %v395_v9, 0.0  ;;  %v124_v13 = vsel %vm21_vm0, %v396_v12, 0.0 }
   0x5   :  { %442 = vmatpush3.bf16.msra.mxu1 %v439_v3  ;;  %122 = vadd.xlane.f32.xlu1 %v121_v10 }
   0x6   :  { %444 = vmatprep.subr.bf16.mxu1 %v443_v8  ;;  %431 = vmatprep.subr.msk.mxu0 %vm231_vm1, %v218_v14 }
   0x7   :  { %432 = vmatpush3.msk.msra.mxu0 %vm231_vm1, %v218_v14 }
   0x8   :  { %26 = vadd.xlane.f32.xlu0 %v25_v11  ;;  %422 = vmatmul.mubr.msk.f32.vlgmr.msra.gmra.mrb[0].mxu1 %vm21_vm0, %v18_v7  ;;  %v365_v11 = vlaneseq }
   0x9   :  { %446 = vmatpush3.bf16.msra.mxu1 %v443_v8  ;;  %428 = vmatprep.mubr.msk.f32.mxu1 %vm21_vm0, %v395_v9 }
   0xa   :  { %125 = vadd.xlane.f32.xlu1 %v124_v13  ;;  %v366_v13 = vshrl.u32 %v365_v11, 7 }
   0xc   :  { %429 = vmatmul.mubr.msk.f32.vlgmr.msra.gmra.mrb[2].mxu1 %vm21_vm0, %v396_v12  ;;  %v367_v14 = vsub.s32 0, %v366_v13 }
  0x91   :  { %v24_v15 = vpop.xlane.xlu0 %23 }
  0x92   :  { %v123_v16 = vpop.xlane.xlu1 %122 }
  0x95   :  { %v27_v17 = vpop.xlane.xlu0 %26 }
  0x96   :  { %447 = vrcp.f32 %v27_v17 }
  0x97   :  { %v126_v18 = vpop.xlane.xlu1 %125  ;;  %449 = vrcp.f32 %v24_v15  ;;  %v320_v15 = vld [vmem:[%s555_s3] sm:$0x3] }
  0x98   :  { %451 = vrcp.f32 %v126_v18  ;;  %v368_v17 = vrot.slane %v320_v15, %v367_v14 }
  0x99   :  { %453 = vrcp.f32 %v123_v16  ;;  %v375_v16 = vsub.s32 1, %v366_v13 }
  0xa0   :  { %v448_v19 = vpop.eup %447 }
  0xa1   :  { %v450_v21 = vpop.eup %449 }
  0xa2   :  { %v452_v24 = vpop.eup %451 }
  0xa3   :  { %v454_v27 = vpop.eup %453 }
  0xdb   :  { %v423_v20 = vpop.f32.mrb[0].mxu1 }
  0xdc   :  { %v112_v22 = vmul.f32 %v448_v19, %v423_v20  ;;  %v102_v23 = vpop.f32.mrb[1].mxu1  ;;  %v376_v19 = vrot.slane %v320_v15, %v375_v16 }
  0xdd   :  { %v111_v25 = vmul.f32 %v450_v21, %v102_v23 }
  0xde   :  { %115 = vst.msk [vmem:[#allocation2 + $0x8] sm:$0xff] %vm113_vm2, %v112_v22 }
  0xdf   :  { %114 = vst.msk [vmem:[#allocation2] sm:$0xff] %vm113_vm2, %v111_v25  ;;  %v430_v26 = vpop.f32.mrb[2].mxu1 }
  0xe0   :  { %v211_v28 = vmul.f32 %v452_v24, %v430_v26  ;;  %v201_v29 = vpop.f32.mrb[3].mxu1 }
  0xe1   :  { %v210_v30 = vmul.f32 %v454_v27, %v201_v29 }
  0xe2   :  { %213 = vst.msk [vmem:[#allocation2 + $0x18] sm:$0xff] %vm113_vm2, %v211_v28 }
  0xe3   :  { %212 = vst.msk [vmem:[#allocation2 + $0x10] sm:$0xff] %vm113_vm2, %v210_v30 }
  0xe5   :  { %v215_v32 = vld [vmem:[#allocation2 + $0x8] sm:$0xff] }
  0xe6   :  { %v214_v31 = vld [vmem:[#allocation2] sm:$0xff] }
  0xe7   :  { %433 = vmatprep.mubr.msk.f32.mxu0 %vm113_vm2, %v214_v31 }
  0xe8   :  { %434 = vmatmul.mubr.msk.f32.vlgmr.msra.gmra.mrb[0].mxu0 %vm113_vm2, %v215_v32 }
  0xe9   :  { %v217_v34 = vld [vmem:[#allocation2 + $0x18] sm:$0xff] }
  0xea   :  { %v216_v33 = vld [vmem:[#allocation2 + $0x10] sm:$0xff] }
  0xeb   :  { %436 = vmatprep.mubr.msk.f32.mxu0 %vm113_vm2, %v216_v33 }
  0xec   :  { %437 = vmatmul.mubr.msk.f32.gmra.mrb[2].mxu0 %vm113_vm2, %v217_v34 }
 0x1bb   :  { %v435_v35 = vpop.f32.mrb[0].mxu0 }
 0x1bc   :  { %v323_v36 = vsel %vm321_vm3, %v435_v35, 0.0  ;;  %v301_v37 = vpop.f32.mrb[1].mxu0 }
 0x1bd   :  { %v322_v38 = vsel %vm321_vm3, %v301_v37, 0.0 }
 0x1be   :  { %v324_v39 = vadd.f32 %v323_v36, %v322_v38 }
 0x1bf   :  { %v438_v40 = vpop.f32.mrb[2].mxu0 }
 0x1c0   :  { %v311_v41 = vpop.f32.mrb[3].mxu0  ;;  %v327_v44 = vsel %vm321_vm3, %v438_v40, 0.0 }
 0x1c1   :  { %v325_v42 = vsel %vm321_vm3, %v311_v41, 0.0 }
 0x1c2   :  { %v326_v43 = vadd.f32 %v325_v42, %v324_v39 }
 0x1c4   :  { %v328_v45 = vadd.f32 %v327_v44, %v326_v43 }
 0x1c6   :  { %v329_v46 = vrot.slane %v328_v45, 4 }
 0x1c8   :  { %v330_v47 = vadd.f32 %v329_v46, %v328_v45 }
 0x1ca   :  { %v331_v48 = vrot.slane %v330_v47, 2 }
 0x1cc   :  { %v332_v49 = vadd.f32 %v331_v48, %v330_v47 }
 0x1ce   :  { %v333_v50 = vrot.slane %v332_v49, 1 }
 0x1d0   :  { %v334_v51 = vadd.f32 %v333_v50, %v332_v49 }
 0x1d2   :  { %v336_v52 = vmul.f32 0.03125, %v334_v51 }
 0x1d4   :  { %v337_v53 = vsub.f32 %v301_v37, %v336_v52  ;;  %v338_v54 = vsub.f32 %v435_v35, %v336_v52  ;;  %v339_v55 = vsub.f32 %v311_v41, %v336_v52  ;;  %v340_v56 = vsub.f32 %v438_v40, %v336_v52 }
 0x1d6   :  { %v341_v57 = vmul.f32 %v337_v53, %v337_v53  ;;  %v342_v58 = vmul.f32 %v338_v54, %v338_v54  ;;  %v343_v59 = vmul.f32 %v339_v55, %v339_v55  ;;  %v344_v60 = vmul.f32 %v340_v56, %v340_v56 }
 0x1d8   :  { %v345_v61 = vsel %vm321_vm3, %v341_v57, 0.0  ;;  %v346_v62 = vsel %vm321_vm3, %v342_v58, 0.0  ;;  %v348_v0 = vsel %vm321_vm3, %v343_v59, 0.0  ;;  %v350_v2 = vsel %vm321_vm3, %v344_v60, 0.0 }
 0x1d9   :  { %v347_v63 = vadd.f32 %v346_v62, %v345_v61 }
 0x1db   :  { %v349_v1 = vadd.f32 %v348_v0, %v347_v63 }
 0x1dd   :  { %v351_v3 = vadd.f32 %v350_v2, %v349_v1 }
 0x1df   :  { %v352_v4 = vrot.slane %v351_v3, 4 }
 0x1e1   :  { %v353_v5 = vadd.f32 %v352_v4, %v351_v3 }
 0x1e3   :  { %v354_v6 = vrot.slane %v353_v5, 2 }
 0x1e5   :  { %v355_v7 = vadd.f32 %v354_v6, %v353_v5 }
 0x1e7   :  { %v356_v8 = vrot.slane %v355_v7, 1 }
 0x1e9   :  { %v357_v9 = vadd.f32 %v356_v8, %v355_v7 }
 0x1eb   :  { %v358_v10 = vmul.f32 0.03125, %v357_v9 }
 0x1ed   :  { %v359_v12 = vadd.f32 1e-05, %v358_v10 }
 0x1ef   :  { %455 = vrsqrt.f32 %v359_v12 }
 0x1f9   :  { %v456_v18 = vpop.eup %455 }
 0x1fa   :  { %v361_v20 = vmul.f32 %v456_v18, %v337_v53  ;;  %v362_v21 = vmul.f32 %v456_v18, %v338_v54  ;;  %v363_v22 = vmul.f32 %v456_v18, %v339_v55  ;;  %v364_v23 = vmul.f32 %v456_v18, %v340_v56 }
 0x1fc   :  { %v369_v24 = vmul.f32 %v368_v17, %v361_v20  ;;  %v370_v25 = vmul.f32 %v368_v17, %v362_v21  ;;  %v371_v26 = vmul.f32 %v368_v17, %v363_v22  ;;  %v372_v27 = vmul.f32 %v368_v17, %v364_v23 }
 0x1fe   :  { %v377_v28 = vadd.f32 %v376_v19, %v369_v24  ;;  %v378_v29 = vadd.f32 %v376_v19, %v370_v25  ;;  %v379_v30 = vadd.f32 %v376_v19, %v371_v26  ;;  %v380_v31 = vadd.f32 %v376_v19, %v372_v27 }
 0x200   :  { %v381_v32 = vmax.f32 %v377_v28, 0.0  ;;  %v382_v33 = vmax.f32 %v378_v29, 0.0  ;;  %v383_v34 = vmax.f32 %v379_v30, 0.0  ;;  %v384_v35 = vmax.f32 %v380_v31, 0.0 }
 0x202   :  { %385 = vst.msk [vmem:[%s556_s4] sm:$0xff] %vm321_vm3, %v381_v32  ;;  %386 = vst.msk [vmem:[%s556_s4 + $0x8] sm:$0xff] %vm321_vm3, %v382_v33 }
 0x203   :  { %387 = vst.msk [vmem:[%s556_s4 + $0x10] sm:$0xff] %vm321_vm3, %v383_v34  ;;  %388 = vst.msk [vmem:[%s556_s4 + $0x18] sm:$0xff] %vm321_vm3, %v384_v35 }

</bundles_post_ra>
